<compile_context>
chip_gen: v7x
topology: tpu7x:2x2x1
jax: 0.10.0
libtpu: 0.0.40
codegen_flags: <defaults>
</compile_context>

<pallas_src>
import functools

import jax
import jax.numpy as jnp
from jax.experimental import pallas as pl
from jax.experimental.pallas import tpu as pltpu


# --------------------------------------------------------------------------
# Kernels
# --------------------------------------------------------------------------

def _se_kernel_flat(inv_l, x_ref, pool_ref, w1t_ref, b1_ref, w2t_ref, b2_ref,
                    expand_ref, out_ref):
    """Lane-dense path: x block is (bt, C*L), with C*L a multiple of 128."""
    x = x_ref[...]                                            # (bt, C*L), x dtype

    # Squeeze: per-channel mean via a 0/1 ones-matrix matmul (f32 accumulation
    # on the MXU; exact 1/L scaling applied afterwards -> unbiased for bf16).
    pooled = jnp.dot(x, pool_ref[...],
                     preferred_element_type=jnp.float32) * inv_l      # (bt, C)

    # fc1 (1x1 conv) + ReLU, row-vector form.
    h = jnp.dot(pooled, w1t_ref[...], preferred_element_type=jnp.float32)
    h = jnp.maximum(h + b1_ref[...], 0.0)                             # (bt, S)

    # fc2 (1x1 conv) + Sigmoid.
    s = jnp.dot(h, w2t_ref[...], preferred_element_type=jnp.float32)
    s = jax.nn.sigmoid(s + b2_ref[...])                               # (bt, C)

    # Excitation: broadcast each channel's scale across its L lanes with a
    # 0/1 matmul; the block-sized multiply stays in the input dtype.
    scale = jnp.dot(s.astype(x.dtype), expand_ref[...],
                    preferred_element_type=jnp.float32).astype(x.dtype)
    out_ref[...] = (x * scale).astype(out_ref.dtype)


def _se_kernel_ncl(x_ref, w1t_ref, b1_ref, w2t_ref, b2_ref, out_ref):
    """NCL path: x block is (bt, C, L) (lane-dense iff L % 128 == 0)."""
    x = x_ref[...]                                            # (bt, C, L)
    inv_l = 1.0 / x.shape[-1]

    # Squeeze: f32 accumulation in the reduce (no f32 copy of the block).
    pooled = jnp.sum(x, axis=-1, dtype=jnp.float32) * inv_l   # (bt, C)

    h = jnp.dot(pooled, w1t_ref[...], preferred_element_type=jnp.float32)
    h = jnp.maximum(h + b1_ref[...], 0.0)                     # (bt, S)

    s = jnp.dot(h, w2t_ref[...], preferred_element_type=jnp.float32)
    s = jax.nn.sigmoid(s + b2_ref[...])                       # (bt, C)

    # Multiply in the input dtype; cast only the tiny (bt, C) scale.
    out_ref[...] = (x * s.astype(x.dtype)[:, :, None]).astype(out_ref.dtype)


# --------------------------------------------------------------------------
# Tiling helpers
# --------------------------------------------------------------------------

def _pick_batch_tile(B, bytes_per_batch, max_block_bytes, two_cores,
                     need_sublane_mult):
    """Choose how many batch rows to fold into one streamed block.

    - must divide B (no ragged edge blocks);
    - for the flattened 2-D path the sublane dim (bt) must be a multiple of 8
      or the full batch;
    - prefer the biggest VMEM-safe slab, with a mild preference for
      sublane-aligned (multiple-of-8) folds;
    - on dual-TensorCore chips prefer an even number of grid steps.
    Returns None when no legal tile exists (caller falls back to NCL path).
    """
    def legal(d):
        if d < 1 or B % d:
            return False
        if need_sublane_mult and d != B and d % 8 != 0:
            return False
        return True

    budget = max(1, max_block_bytes // max(bytes_per_batch, 1))
    candidates = sorted((d for d in range(1, B + 1) if legal(d) and d <= budget),
                        reverse=True)
    if not candidates:
        return None

    bt = candidates[0]
    # Prefer a multiple-of-8 fold if it is at least half the best slab size.
    for d in candidates:
        if d % 8 == 0:
            if d * 2 >= bt:
                bt = d
            break
    # Dual-TC chips: if everything fits in one step, split into an even number
    # of steps so both TensorCores get work (only among legal tiles).
    if two_cores and bt == B and B >= 2:
        for d in candidates:
            if d < B and (B // d) % 2 == 0:
                bt = d
                break
    return bt


# --------------------------------------------------------------------------
# Wrapper
# --------------------------------------------------------------------------

def squeeze_excitation(x, w1, b1, w2, b2):
    """Squeeze-and-Excitation forward.

    x:  (B, C, L)  input, NCL layout (as torch.nn.Conv1d expects).
    w1: (S, C)     fc1 weight (Conv1d weight (S, C, 1) squeezed), b1: (S,)
    w2: (C, S)     fc2 weight,                                    b2: (C,)
    """
    B, C, L = x.shape
    S = w1.shape[0]
    dtype = x.dtype
    itemsize = jnp.dtype(dtype).itemsize
    CL = C * L

    # ---- Per-generation sizing (v5e/v6e: 128 MiB VMEM, 1 TC; v7x: 64 MiB, 2 TC)
    try:
        vmem_cap = int(pltpu.get_tpu_info().vmem_capacity_bytes)
    except Exception:                       # no info at trace time -> conservative
        vmem_cap = 64 << 20
    if vmem_cap >= (128 << 20):             # v5e / v6e
        max_block_bytes = 12 << 20
        vmem_clamp = 96 << 20
        two_cores = False
    else:                                   # v7x-class (64 MiB per TC, 2 TCs)
        max_block_bytes = 6 << 20
        vmem_clamp = 40 << 20
        two_cores = True

    # ---- Lane-dense parameter layouts for the row-vector squeeze path
    w1t = jnp.transpose(w1).astype(jnp.float32)               # (C, S)
    w2t = jnp.transpose(w2).astype(jnp.float32)               # (S, C)
    b1r = jnp.reshape(b1, (1, S)).astype(jnp.float32)         # (1, S)
    b2r = jnp.reshape(b2, (1, C)).astype(jnp.float32)         # (1, C)

    bytes_per_batch = CL * itemsize

    # ---- Choose the streaming layout
    lane_dense_3d = (L % 128 == 0)
    pool_mat_bytes = CL * C * itemsize
    flat_candidate = (not lane_dense_3d) and (CL % 128 == 0) \
        and (pool_mat_bytes <= (2 << 20))

    use_flat = False
    bt = None
    if flat_candidate:
        bt = _pick_batch_tile(B, bytes_per_batch, max_block_bytes, two_cores,
                              need_sublane_mult=True)
        use_flat = bt is not None
    if not use_flat:
        # TODO(synk): per-batch slabs that exceed max_block_bytes even at bt=1
        # need an L-tiled two-pass kernel (pool pass + streaming scale pass).
        bt = _pick_batch_tile(B, bytes_per_batch, max_block_bytes, two_cores,
                              need_sublane_mult=False)

    grid = (B // bt,)

    # ---- VMEM budget & cost hint
    block_in_bytes = bt * bytes_per_batch
    block_f32_bytes = bt * CL * 4           # in-kernel f32 scale/expand temp
    param_bytes = 4 * (2 * C * S + S + C) + (2 * pool_mat_bytes if use_flat else 0)
    vmem_limit = 4 * block_in_bytes + 2 * block_f32_bytes + 2 * param_bytes + (2 << 20)
    vmem_limit = int(min(max(vmem_limit, 16 << 20), vmem_clamp))

    cost = pl.CostEstimate(
        flops=int(B * (3 * CL + 4 * C * S)),      # pool + excite + two matmuls
        transcendentals=int(B * C),               # sigmoid
        bytes_accessed=int(2 * B * CL * itemsize + param_bytes),
    )
    cparams = pltpu.CompilerParams(
        dimension_semantics=("parallel",),
        vmem_limit_bytes=vmem_limit,
    )

    if use_flat:
        x_flat = jnp.reshape(x, (B, CL))
        ch = jnp.arange(C)
        # pool_mat[c*L + l, c'] = 1 iff c == c' ; expand_mat is its transpose.
        pool_mat = (jnp.repeat(ch, L)[:, None] == ch[None, :]).astype(dtype)  # (C*L, C)
        expand_mat = jnp.transpose(pool_mat)                                   # (C, C*L)

        out_flat = pl.pallas_call(
            functools.partial(_se_kernel_flat, 1.0 / L),
            out_shape=jax.ShapeDtypeStruct((B, CL), dtype),
            grid_spec=pltpu.PrefetchScalarGridSpec(
                num_scalar_prefetch=0,
                grid=grid,
                in_specs=[
                    pl.BlockSpec((bt, CL), lambda b: (b, 0)),
                    pl.BlockSpec((CL, C), lambda b: (0, 0)),
                    pl.BlockSpec((C, S), lambda b: (0, 0)),
                    pl.BlockSpec((1, S), lambda b: (0, 0)),
                    pl.BlockSpec((S, C), lambda b: (0, 0)),
                    pl.BlockSpec((1, C), lambda b: (0, 0)),
                    pl.BlockSpec((C, CL), lambda b: (0, 0)),
                ],
                out_specs=pl.BlockSpec((bt, CL), lambda b: (b, 0)),
            ),
            compiler_params=cparams,
            cost_estimate=cost,
        )(x_flat, pool_mat, w1t, b1r, w2t, b2r, expand_mat)
        return jnp.reshape(out_flat, (B, C, L))

    return pl.pallas_call(
        _se_kernel_ncl,
        out_shape=jax.ShapeDtypeStruct((B, C, L), dtype),
        grid_spec=pltpu.PrefetchScalarGridSpec(
            num_scalar_prefetch=0,
            grid=grid,
            in_specs=[
                pl.BlockSpec((bt, C, L), lambda b: (b, 0, 0)),
                pl.BlockSpec((C, S), lambda b: (0, 0)),
                pl.BlockSpec((1, S), lambda b: (0, 0)),
                pl.BlockSpec((S, C), lambda b: (0, 0)),
                pl.BlockSpec((1, C), lambda b: (0, 0)),
            ],
            out_specs=pl.BlockSpec((bt, C, L), lambda b: (b, 0, 0)),
        ),
        compiler_params=cparams,
        cost_estimate=cost,
    )(x, w1t, b1r, w2t, b2r)


def _reference(x, w1, b1, w2, b2):
    pooled = jnp.mean(x, axis=-1)                             # (B, C)
    h = jnp.maximum(pooled @ w1.T + b1[None, :], 0.0)         # (B, S)
    s = jax.nn.sigmoid(h @ w2.T + b2[None, :])                # (B, C)
    return s[:, :, None] * x


if __name__ == "__main__":
    B, C, S, L = 2, 16, 4, 32

    key = jax.random.PRNGKey(0)
    kx, kw1, kb1, kw2, kb2 = jax.random.split(key, 5)

    x = jax.random.normal(kx, (B, C, L), dtype=jnp.float32)

    # Deterministic Conv1d-style init (uniform in +-1/sqrt(fan_in)), kernel size 1.
    bound1 = 1.0 / (C ** 0.5)
    w1 = jax.random.uniform(kw1, (S, C), jnp.float32, -bound1, bound1)
    b1 = jax.random.uniform(kb1, (S,), jnp.float32, -bound1, bound1)
    bound2 = 1.0 / (S ** 0.5)
    w2 = jax.random.uniform(kw2, (C, S), jnp.float32, -bound2, bound2)
    b2 = jax.random.uniform(kb2, (C,), jnp.float32, -bound2, bound2)

    out = squeeze_excitation(x, w1, b1, w2, b2)
    jax.block_until_ready(out)

    ref = _reference(x, w1, b1, w2, b2)
    assert out.shape == (B, C, L)
    assert jnp.allclose(out, ref, atol=1e-5, rtol=1e-5), "mismatch vs reference"

    print("KERNEL_OK")
</pallas_src>

<mosaic_0001>
module attributes {stable_mosaic.version = 11 : i64} {
  func.func @_se_kernel_flat(%arg0: i32, %arg1: memref<2x512xf32, #tpu.memory_space<vmem>>, %arg2: memref<512x16xf32, #tpu.memory_space<vmem>>, %arg3: memref<16x4xf32, #tpu.memory_space<vmem>>, %arg4: memref<1x4xf32, #tpu.memory_space<vmem>>, %arg5: memref<4x16xf32, #tpu.memory_space<vmem>>, %arg6: memref<1x16xf32, #tpu.memory_space<vmem>>, %arg7: memref<16x512xf32, #tpu.memory_space<vmem>>, %arg8: memref<2x512xf32, #tpu.memory_space<vmem>>) attributes {dimension_semantics = [#tpu.dimension_semantics<parallel>], iteration_bounds = array<i64: 1>, scalar_prefetch = 0 : i64, scratch_operands = 0 : i64, tpu.core_type = #tpu.core_type<tc>, window_params = [{transform_indices = @transform_0, window_bounds = array<i64: 2, 512>}, {pipeline_mode = #tpu.pipeline_mode<synchronous>, transform_indices = @transform_1, window_bounds = array<i64: 512, 16>}, {pipeline_mode = #tpu.pipeline_mode<synchronous>, transform_indices = @transform_2, window_bounds = array<i64: 16, 4>}, {pipeline_mode = #tpu.pipeline_mode<synchronous>, transform_indices = @transform_3, window_bounds = array<i64: 1, 4>}, {pipeline_mode = #tpu.pipeline_mode<synchronous>, transform_indices = @transform_4, window_bounds = array<i64: 4, 16>}, {pipeline_mode = #tpu.pipeline_mode<synchronous>, transform_indices = @transform_5, window_bounds = array<i64: 1, 16>}, {pipeline_mode = #tpu.pipeline_mode<synchronous>, transform_indices = @transform_6, window_bounds = array<i64: 16, 512>}, {transform_indices = @transform_7, window_bounds = array<i64: 2, 512>}]} {
    %c0 = arith.constant 0 : index
    %c0_0 = arith.constant 0 : index
    %0 = vector.load %arg1[%c0, %c0_0] : memref<2x512xf32, #tpu.memory_space<vmem>>, vector<2x512xf32>
    %c0_1 = arith.constant 0 : index
    %c0_2 = arith.constant 0 : index
    %1 = vector.load %arg2[%c0_1, %c0_2] : memref<512x16xf32, #tpu.memory_space<vmem>>, vector<512x16xf32>
    %cst = arith.constant dense<0.000000e+00> : vector<2x16xf32>
    %2 = tpu.matmul %0, %1, %cst {dimension_numbers = #tpu.dot_dimension_numbers<[1], [0], [0], [1], [0, 0, 1, 1], [], []>} : vector<2x512xf32>, vector<512x16xf32>, vector<2x16xf32> -> vector<2x16xf32>
    %cst_3 = arith.constant 3.125000e-02 : f32
    %3 = vector.broadcast %cst_3 : f32 to vector<2x16xf32>
    %4 = arith.mulf %2, %3 : vector<2x16xf32>
    %c0_4 = arith.constant 0 : index
    %c0_5 = arith.constant 0 : index
    %5 = vector.load %arg3[%c0_4, %c0_5] : memref<16x4xf32, #tpu.memory_space<vmem>>, vector<16x4xf32>
    %cst_6 = arith.constant dense<0.000000e+00> : vector<2x4xf32>
    %6 = tpu.matmul %4, %5, %cst_6 {dimension_numbers = #tpu.dot_dimension_numbers<[1], [0], [0], [1], [0, 0, 1, 1], [], []>} : vector<2x16xf32>, vector<16x4xf32>, vector<2x4xf32> -> vector<2x4xf32>
    %c0_7 = arith.constant 0 : index
    %c0_8 = arith.constant 0 : index
    %7 = vector.load %arg4[%c0_7, %c0_8] : memref<1x4xf32, #tpu.memory_space<vmem>>, vector<1x4xf32>
    %8 = vector.broadcast %7 : vector<1x4xf32> to vector<2x4xf32>
    %9 = arith.addf %6, %8 : vector<2x4xf32>
    %cst_9 = arith.constant 0.000000e+00 : f32
    %10 = vector.broadcast %cst_9 : f32 to vector<2x4xf32>
    %11 = arith.maximumf %9, %10 : vector<2x4xf32>
    %c0_10 = arith.constant 0 : index
    %c0_11 = arith.constant 0 : index
    %12 = vector.load %arg5[%c0_10, %c0_11] : memref<4x16xf32, #tpu.memory_space<vmem>>, vector<4x16xf32>
    %cst_12 = arith.constant dense<0.000000e+00> : vector<2x16xf32>
    %13 = tpu.matmul %11, %12, %cst_12 {dimension_numbers = #tpu.dot_dimension_numbers<[1], [0], [0], [1], [0, 0, 1, 1], [], []>} : vector<2x4xf32>, vector<4x16xf32>, vector<2x16xf32> -> vector<2x16xf32>
    %c0_13 = arith.constant 0 : index
    %c0_14 = arith.constant 0 : index
    %14 = vector.load %arg6[%c0_13, %c0_14] : memref<1x16xf32, #tpu.memory_space<vmem>>, vector<1x16xf32>
    %15 = vector.broadcast %14 : vector<1x16xf32> to vector<2x16xf32>
    %16 = arith.addf %13, %15 : vector<2x16xf32>
    %17 = arith.negf %16 : vector<2x16xf32>
    %18 = math.exp %17 : vector<2x16xf32>
    %cst_15 = arith.constant 1.000000e+00 : f32
    %19 = vector.broadcast %cst_15 : f32 to vector<2x16xf32>
    %20 = arith.addf %19, %18 : vector<2x16xf32>
    %21 = arith.divf %19, %20 : vector<2x16xf32>
    %c0_16 = arith.constant 0 : index
    %c0_17 = arith.constant 0 : index
    %22 = vector.load %arg7[%c0_16, %c0_17] : memref<16x512xf32, #tpu.memory_space<vmem>>, vector<16x512xf32>
    %cst_18 = arith.constant dense<0.000000e+00> : vector<2x512xf32>
    %23 = tpu.matmul %21, %22, %cst_18 {dimension_numbers = #tpu.dot_dimension_numbers<[1], [0], [0], [1], [0, 0, 1, 1], [], []>} : vector<2x16xf32>, vector<16x512xf32>, vector<2x512xf32> -> vector<2x512xf32>
    %24 = arith.mulf %0, %23 : vector<2x512xf32>
    %c0_19 = arith.constant 0 : index
    %c0_20 = arith.constant 0 : index
    %25 = vector.load %arg8[%c0_19, %c0_20] : memref<2x512xf32, #tpu.memory_space<vmem>>, vector<2x512xf32>
    tpu.vector_store %arg8[%c0_19, %c0_20], %24 {strides = array<i32>} : memref<2x512xf32, #tpu.memory_space<vmem>>, vector<2x512xf32>,
    return
  }
  func.func @transform_0(%arg0: i32) -> (i32, i32) {
    %c0_i32 = arith.constant 0 : i32
    %c0_i32_0 = arith.constant 0 : i32
    return %arg0, %c0_i32 : i32, i32
  }
  func.func @transform_1(%arg0: i32) -> (i32, i32) {
    %c0_i32 = arith.constant 0 : i32
    %c0_i32_0 = arith.constant 0 : i32
    %c0_i32_1 = arith.constant 0 : i32
    return %c0_i32, %c0_i32_0 : i32, i32
  }
  func.func @transform_2(%arg0: i32) -> (i32, i32) {
    %c0_i32 = arith.constant 0 : i32
    %c0_i32_0 = arith.constant 0 : i32
    %c0_i32_1 = arith.constant 0 : i32
    return %c0_i32, %c0_i32_0 : i32, i32
  }
  func.func @transform_3(%arg0: i32) -> (i32, i32) {
    %c0_i32 = arith.constant 0 : i32
    %c0_i32_0 = arith.constant 0 : i32
    %c0_i32_1 = arith.constant 0 : i32
    return %c0_i32, %c0_i32_0 : i32, i32
  }
  func.func @transform_4(%arg0: i32) -> (i32, i32) {
    %c0_i32 = arith.constant 0 : i32
    %c0_i32_0 = arith.constant 0 : i32
    %c0_i32_1 = arith.constant 0 : i32
    return %c0_i32, %c0_i32_0 : i32, i32
  }
  func.func @transform_5(%arg0: i32) -> (i32, i32) {
    %c0_i32 = arith.constant 0 : i32
    %c0_i32_0 = arith.constant 0 : i32
    %c0_i32_1 = arith.constant 0 : i32
    return %c0_i32, %c0_i32_0 : i32, i32
  }
  func.func @transform_6(%arg0: i32) -> (i32, i32) {
    %c0_i32 = arith.constant 0 : i32
    %c0_i32_0 = arith.constant 0 : i32
    %c0_i32_1 = arith.constant 0 : i32
    return %c0_i32, %c0_i32_0 : i32, i32
  }
  func.func @transform_7(%arg0: i32) -> (i32, i32) {
    %c0_i32 = arith.constant 0 : i32
    %c0_i32_0 = arith.constant 0 : i32
    return %arg0, %c0_i32 : i32, i32
  }
}

</mosaic_0001>

<bundles_post_ra>
// kernel: tpu_custom_call.1
= control target key start
LH: loop header
LB: loop body
LE: loop exit
PB: predicated region body
PF: predicated region fallthrough
CT: control target
= control target key end

     0   :  { %v826_v47 = vmov 1983009808   ;;  %v97_v49 = vlaneseq  ;;  %s1132_s0 = inlined_call_operand.vmem [shape: f32[2,512], index: 0, kind: input, shape index: {}]   ;;  %s1133_s1 = inlined_call_operand.vmem [shape: f32[512,16], index: 1, kind: input, shape index: {}]   ;;  %s1134_s2 = inlined_call_operand.vmem [shape: f32[16,4], index: 2, kind: input, shape index: {}]   ;;  %s1135_s3 = inlined_call_operand.vmem [shape: f32[1,4], index: 3, kind: input, shape index: {}]   ;;  %s1136_s4 = inlined_call_operand.vmem [shape: f32[4,16], index: 4, kind: input, shape index: {}]   ;;  %s1137_s5 = inlined_call_operand.vmem [shape: f32[1,16], index: 5, kind: input, shape index: {}]   ;;  %s1138_s6 = inlined_call_operand.vmem [shape: f32[16,512], index: 6, kind: input, shape index: {}]   ;;  %s1139_s7 = inlined_call_operand.hbm [shape: f32[2,512], index: 7, kind: output, shape index: {}]  }
   0x1   :  { %v44_v0 = vld [vmem:[%s1133_s1 + $0x80] sm:$0xff]  ;;  %v45_v1 = vld [vmem:[%s1133_s1 + $0x88] sm:$0xff]  ;;  %v46_v11 = vld [vmem:[%s1133_s1 + $0x90] sm:$0xff]  ;;  %v95_v48 = vunpack.c.l.s4 %v826_v47 }
   0x2   :  { %v76_v2 = vld [vmem:[%s1133_s1 + $0x180] sm:$0xff]  ;;  %v717_v3 = vpack.c.bf16 %v45_v1, %v44_v0  ;;  %v77_v4 = vld [vmem:[%s1133_s1 + $0x188] sm:$0xff]  ;;  %v47_v13 = vld [vmem:[%s1133_s1 + $0x98] sm:$0xff]  ;;  %v98_v0 = vshrl.u32 %v97_v49, 7 }
   0x3   :  { %v28_v5 = vld [vmem:[%s1133_s1] sm:$0xff]  ;;  %v29_v6 = vld [vmem:[%s1133_s1 + $0x8] sm:$0xff]  ;;  %v749_v7 = vpack.c.bf16 %v77_v4, %v76_v2  ;;  %v78_v14 = vld [vmem:[%s1133_s1 + $0x190] sm:$0xff]  ;;  %v721_v16 = vpack.c.bf16 %v47_v13, %v46_v11  ;;  %v96_v63 = vunpack.c.0.s8 %v95_v48 }
   0x4   :  { %v719_v8 = vpack.c.bf16 %v29_v6, %v28_v5  ;;  %v60_v9 = vld [vmem:[%s1133_s1 + $0x100] sm:$0xff]  ;;  %v61_v10 = vld [vmem:[%s1133_s1 + $0x108] sm:$0xff]  ;;  %718 = vmatprep.subr.bf16.mxu0 %v717_v3  ;;  %v79_v15 = vld [vmem:[%s1133_s1 + $0x198] sm:$0xff] }
   0x5   :  { %v751_v12 = vpack.c.bf16 %v61_v10, %v60_v9  ;;  %750 = vmatprep.subr.bf16.mxu1 %v749_v7  ;;  %v753_v17 = vpack.c.bf16 %v79_v15, %v78_v14  ;;  %v30_v18 = vld [vmem:[%s1133_s1 + $0x10] sm:$0xff]  ;;  %v31_v19 = vld [vmem:[%s1133_s1 + $0x18] sm:$0xff]  ;;  %v48_v23 = vld [vmem:[%s1133_s1 + $0xa0] sm:$0xff]  ;;  %v1021_v13 = vsub.s32 %v96_v63, %v98_v0 }
   0x6   :  { %720 = vmatpush3.bf16.msra.mxu0 %v719_v8  ;;  %v62_v20 = vld [vmem:[%s1133_s1 + $0x110] sm:$0xff]  ;;  %v723_v21 = vpack.c.bf16 %v31_v19, %v30_v18  ;;  %v63_v22 = vld [vmem:[%s1133_s1 + $0x118] sm:$0xff]  ;;  %v49_v24 = vld [vmem:[%s1133_s1 + $0xa8] sm:$0xff] }
   0x7   :  { %752 = vmatpush3.bf16.msra.mxu1 %v751_v12  ;;  %722 = vmatprep.subr.bf16.mxu0 %v721_v16  ;;  %v755_v25 = vpack.c.bf16 %v63_v22, %v62_v20  ;;  %v725_v26 = vpack.c.bf16 %v49_v24, %v48_v23  ;;  %v80_v27 = vld [vmem:[%s1133_s1 + $0x1a0] sm:$0xff]  ;;  %v81_v28 = vld [vmem:[%s1133_s1 + $0x1a8] sm:$0xff]  ;;  %v50_v35 = vld [vmem:[%s1133_s1 + $0xb0] sm:$0xff] }
   0x8   :  { %754 = vmatprep.subr.bf16.mxu1 %v753_v17  ;;  %v32_v29 = vld [vmem:[%s1133_s1 + $0x20] sm:$0xff]  ;;  %v757_v30 = vpack.c.bf16 %v81_v28, %v80_v27  ;;  %v33_v31 = vld [vmem:[%s1133_s1 + $0x28] sm:$0xff]  ;;  %v51_v36 = vld [vmem:[%s1133_s1 + $0xb8] sm:$0xff] }
   0x9   :  { %v64_v32 = vld [vmem:[%s1133_s1 + $0x120] sm:$0xff]  ;;  %v65_v33 = vld [vmem:[%s1133_s1 + $0x128] sm:$0xff]  ;;  %v727_v34 = vpack.c.bf16 %v33_v31, %v32_v29  ;;  %v82_v37 = vld [vmem:[%s1133_s1 + $0x1b0] sm:$0xff]  ;;  %v729_v39 = vpack.c.bf16 %v51_v36, %v50_v35 }
   0xa   :  { %724 = vmatpush3.bf16.msra.mxu0 %v723_v21  ;;  %v759_v38 = vpack.c.bf16 %v65_v33, %v64_v32  ;;  %v83_v40 = vld [vmem:[%s1133_s1 + $0x1b8] sm:$0xff]  ;;  %v34_v41 = vld [vmem:[%s1133_s1 + $0x30] sm:$0xff]  ;;  %v52_v46 = vld [vmem:[%s1133_s1 + $0xc0] sm:$0xff] }
   0xb   :  { %756 = vmatpush3.bf16.msra.mxu1 %v755_v25  ;;  %726 = vmatprep.subr.bf16.mxu0 %v725_v26  ;;  %v35_v42 = vld [vmem:[%s1133_s1 + $0x38] sm:$0xff]  ;;  %v761_v43 = vpack.c.bf16 %v83_v40, %v82_v37  ;;  %v66_v44 = vld [vmem:[%s1133_s1 + $0x130] sm:$0xff]  ;;  %v53_v50 = vld [vmem:[%s1133_s1 + $0xc8] sm:$0xff] }
   0xc   :  { %758 = vmatprep.subr.bf16.mxu1 %v757_v30  ;;  %v67_v45 = vld [vmem:[%s1133_s1 + $0x138] sm:$0xff]  ;;  %v84_v51 = vld [vmem:[%s1133_s1 + $0x1c0] sm:$0xff]  ;;  %v85_v52 = vld [vmem:[%s1133_s1 + $0x1c8] sm:$0xff]  ;;  %v731_v53 = vpack.c.bf16 %v35_v42, %v34_v41  ;;  %v733_v55 = vpack.c.bf16 %v53_v50, %v52_v46 }
   0xd   :  { %v763_v54 = vpack.c.bf16 %v67_v45, %v66_v44  ;;  %v36_v56 = vld [vmem:[%s1133_s1 + $0x40] sm:$0xff]  ;;  %v37_v57 = vld [vmem:[%s1133_s1 + $0x48] sm:$0xff]  ;;  %v765_v59 = vpack.c.bf16 %v85_v52, %v84_v51  ;;  %v54_v61 = vld [vmem:[%s1133_s1 + $0xd0] sm:$0xff] }
   0xe   :  { %728 = vmatpush3.bf16.msra.mxu0 %v727_v34  ;;  %v68_v58 = vld [vmem:[%s1133_s1 + $0x140] sm:$0xff]  ;;  %v69_v60 = vld [vmem:[%s1133_s1 + $0x148] sm:$0xff]  ;;  %v55_v62 = vld [vmem:[%s1133_s1 + $0xd8] sm:$0xff]  ;;  %v735_v3 = vpack.c.bf16 %v37_v57, %v36_v56 }
   0xf   :  { %760 = vmatpush3.bf16.msra.mxu1 %v759_v38  ;;  %730 = vmatprep.subr.bf16.mxu0 %v729_v39  ;;  %v86_v1 = vld [vmem:[%s1133_s1 + $0x1d0] sm:$0xff]  ;;  %v87_v2 = vld [vmem:[%s1133_s1 + $0x1d8] sm:$0xff]  ;;  %v767_v4 = vpack.c.bf16 %v69_v60, %v68_v58  ;;  %v737_v5 = vpack.c.bf16 %v55_v62, %v54_v61  ;;  %v56_v11 = vld [vmem:[%s1133_s1 + $0xe0] sm:$0xff] }
  0x10   :  { %762 = vmatprep.subr.bf16.mxu1 %v761_v43  ;;  %v38_v6 = vld [vmem:[%s1133_s1 + $0x50] sm:$0xff]  ;;  %v39_v7 = vld [vmem:[%s1133_s1 + $0x58] sm:$0xff]  ;;  %v769_v9 = vpack.c.bf16 %v87_v2, %v86_v1  ;;  %v57_v12 = vld [vmem:[%s1133_s1 + $0xe8] sm:$0xff] }
  0x11   :  { %v70_v8 = vld [vmem:[%s1133_s1 + $0x150] sm:$0xff]  ;;  %v71_v10 = vld [vmem:[%s1133_s1 + $0x158] sm:$0xff]  ;;  %v88_v14 = vld [vmem:[%s1133_s1 + $0x1e0] sm:$0xff]  ;;  %v739_v16 = vpack.c.bf16 %v39_v7, %v38_v6  ;;  %v741_v20 = vpack.c.bf16 %v57_v12, %v56_v11 }
  0x12   :  { %732 = vmatpush3.bf16.msra.mxu0 %v731_v53  ;;  %v89_v15 = vld [vmem:[%s1133_s1 + $0x1e8] sm:$0xff]  ;;  %v40_v17 = vld [vmem:[%s1133_s1 + $0x60] sm:$0xff]  ;;  %v771_v19 = vpack.c.bf16 %v71_v10, %v70_v8 }
  0x13   :  { %764 = vmatpush3.bf16.msra.mxu1 %v763_v54  ;;  %734 = vmatprep.subr.bf16.mxu0 %v733_v55  ;;  %v41_v18 = vld [vmem:[%s1133_s1 + $0x68] sm:$0xff]  ;;  %v72_v21 = vld [vmem:[%s1133_s1 + $0x160] sm:$0xff] }
  0x14   :  { %766 = vmatprep.subr.bf16.mxu1 %v765_v59  ;;  %v1041_v22 = vld [vmem:[%s1132_s0] sm:$0xff] }
  0x16   :  { %736 = vmatpush3.bf16.msra.mxu0 %v735_v3 }
  0x17   :  { %768 = vmatpush3.bf16.msra.mxu1 %v767_v4  ;;  %738 = vmatprep.subr.bf16.mxu0 %v737_v5 }
  0x18   :  { %12 = vsyncpa [#allocation3], 0  ;;  %770 = vmatprep.subr.bf16.mxu1 %v769_v9  ;;  %v773_v23 = vpack.c.bf16 %v89_v15, %v88_v14  ;;  %v73_v24 = vld [vmem:[%s1133_s1 + $0x168] sm:$0xff]  ;;  %v58_v25 = vld [vmem:[%s1133_s1 + $0xf0] sm:$0xff]  ;;  %v100_v27 = vrot.slane %v1041_v22, %v1021_v13  ;;  %v93_v28 = vcombine.high %v1041_v22, %v1041_v22  ;;  %v743_v31 = vpack.c.bf16 %v41_v18, %v40_v17 }
  0x19   :  { %v59_v26 = vld [vmem:[%s1133_s1 + $0xf8] sm:$0xff]  ;;  %v90_v29 = vld [vmem:[%s1133_s1 + $0x1f0] sm:$0xff]  ;;  %v775_v34 = vpack.c.bf16 %v73_v24, %v72_v21  ;;  %v255_v44 = vld [vmem:[%s1134_s2] sm:$0xff]  ;;  %v827_v47 = vmov 0.0|0.0   ;;  %vm828_vm0 = vmmov 0   ;;  %v829_v48 = vmov 0.0  }
  0x1a   :  { %v91_v30 = vld [vmem:[%s1133_s1 + $0x1f8] sm:$0xff]  ;;  %740 = vmatpush3.bf16.msra.mxu0 %v739_v16  ;;  %v108_v32 = vcombine.high %v100_v27, %v100_v27  ;;  %v107_v33 = vrot.slane %v93_v28, %v1021_v13  ;;  %v745_v35 = vpack.c.bf16 %v59_v26, %v58_v25  ;;  %v42_v36 = vld [vmem:[%s1133_s1 + $0x70] sm:$0xff]  ;;  %v256_v45 = vld [vmem:[%s1134_s2 + $0x8] sm:$0xff]  ;;  %vm264_vm1 = vcmask 130048  }
  0x1b   :  { %772 = vmatpush3.bf16.msra.mxu1 %v771_v19  ;;  %742 = vmatprep.subr.bf16.mxu0 %v741_v20  ;;  %v43_v37 = vld [vmem:[%s1133_s1 + $0x78] sm:$0xff]  ;;  %v777_v38 = vpack.c.bf16 %v91_v30, %v90_v29  ;;  %v74_v39 = vld [vmem:[%s1133_s1 + $0x170] sm:$0xff]  ;;  %v782_v46 = vpack.c.bf16 %v256_v45, %v255_v44  ;;  %v339_v57 = vld [vmem:[%s1136_s4] sm:$0xf]  ;;  %vm351_vm2 = vcmask 1043456   ;;  %vm347_vm3 = vcmask 31744  }
  0x1c   :  { %774 = vmatprep.subr.bf16.mxu1 %v773_v23  ;;  %v75_v40 = vld [vmem:[%s1133_s1 + $0x178] sm:$0xff]  ;;  %178 = vmatprep.mubr.f32.mxu0 %v108_v32  ;;  %v109_v41 = vcombine.high %v107_v33, %v107_v33  ;;  %v747_v42 = vpack.c.bf16 %v43_v37, %v42_v36  ;;  %v622_v58 = vld [vmem:[%s1135_s3] ss:$0 sm:$0xff]  ;;  %v432_v63 = vld [vmem:[%s1138_s6 + $0x8] sm:$0xff] }
  0x1d   :  { %v779_v43 = vpack.c.bf16 %v75_v40, %v74_v39  ;;  %v436_v0 = vld [vmem:[%s1138_s6 + $0x28] sm:$0xff]  ;;  %v434_v1 = vld [vmem:[%s1138_s6 + $0x18] sm:$0xff]  ;;  %v431_v4 = vld [vmem:[%s1138_s6] sm:$0xff] }
  0x1e   :  { %744 = vmatpush3.bf16.msra.mxu0 %v743_v31  ;;  %248 = vmatprep.mubr.f32.mxu1 %v109_v41  ;;  %v784_v2 = vpack.c.bf16 %v436_v0, %v432_v63  ;;  %v438_v3 = vld [vmem:[%s1138_s6 + $0x38] sm:$0xff]  ;;  %v435_v5 = vld [vmem:[%s1138_s6 + $0x20] sm:$0xff]  ;;  %v433_v8 = vld [vmem:[%s1138_s6 + $0x10] sm:$0xff] }
  0x1f   :  { %776 = vmatpush3.bf16.msra.mxu1 %v775_v34  ;;  %746 = vmatprep.subr.bf16.mxu0 %v745_v35  ;;  %v788_v6 = vpack.c.bf16 %v438_v3, %v434_v1  ;;  %v786_v7 = vpack.c.bf16 %v435_v5, %v431_v4  ;;  %v437_v9 = vld [vmem:[%s1138_s6 + $0x30] sm:$0xff]  ;;  %v624_v11 = vld [vmem:[%s1137_s5] ss:$0 sm:$0xff]  ;;  %s830_s5 = smov [#allocation2]  }
  0x20   :  { %778 = vmatprep.subr.bf16.mxu1 %v777_v38  ;;  %v790_v10 = vpack.c.bf16 %v437_v9, %v433_v8  ;;  %s614_s6 = sshll.u32 %s830_s5, 4  ;;  %s615_s6 = int_to_ptr.vmem [resolvable:$true] %s614_s6 }
  0x21   :  { %s802_s13 = scalar_lea.vmem %s615_s6, 128  ;;  %p807_p1 = scmp.lt.s32.totalorder %s615_s6, %s615_s6 }
  0x22   :  { %748 = vmatpush3.bf16.msra.mxu0 %v747_v42  ;;  %p803_p0 = scmp.ne.s32.totalorder %s615_s6, %s802_s13  ;;  %p808_p2 = scmp.lt.s32.totalorder %s802_s13, %s802_s13 }
  0x23   :  { %780 = vmatpush3.bf16.msra.mxu1 %v779_v43  ;;  %781 = vmatprep.subr.bf16.mxu0 %v827_v47 }
  0x24   :  { %712 = vmatprep.subr.mxu1 %v829_v48  ;;  %p809_p3 = por %p808_p2, %p807_p1 }
  0x25   :  { %179 = vmatmul.mubr.f32.vlgmr.msra.gmra.mrb[0].mxu0 %v100_v27 }
  0x26   :  { %249 = vmatmul.mubr.f32.vlgmr.msra.gmra.mrb[0].mxu1 %v107_v33  ;;  %783 = vmatpush3.bf16.msra.mxu0 %v782_v46  ;;  %p810_p4 = pnand %p809_p3, %p803_p0 }
  0x27   :  { %709 = vmatprep.mubr.msk.f32.mxu0 %vm828_vm0, %v829_v48  ;;  %714 = vmatprep.mubr.msk.f32.mxu1 %vm828_vm0, %v829_v48 }
  0x28   :  { %713 = vmatpush3.msk.msra.mxu1 %vm351_vm2, %v339_v57  ;;  %785 = vmatprep.subr.bf16.mxu0 %v784_v2 }
  0x29   :  { %789 = vmatprep.subr.bf16.mxu1 %v788_v6 }
  0xf8   :  { %v662_v49 = vpop.f32.mrb[0].mxu0 }
  0xf9   :  { %v697_v50 = vpop.f32.mrb[0].mxu1  ;;  %v663_v51 = vpop.f32.mrb[1].mxu0 }
  0xfa   :  { %v664_v52 = vadd.f32 %v663_v51, %v662_v49  ;;  %v698_v53 = vpop.f32.mrb[1].mxu1 }
  0xfb   :  { %v699_v54 = vadd.f32 %v698_v53, %v697_v50 }
  0xfd   :  { %v251_v55 = vadd.f32 %v699_v54, %v664_v52 }
  0xff   :  { %v254_v56 = vmul.f32 0.03125, %v251_v55 }
 0x101   :  { %710 = vmatmul.mubr.msk.f32.vlgmr.msra.gmra.mrb[2].mxu0 %vm264_vm1, %v254_v56 }
 0x102   :  { %506 = vmatprep.mubr.f32.mxu0 %v829_v48  ;;  %787 = vmatpush1.bf16.msra.mxu0 %v786_v7 }
 0x1d4   :  { %v334_v59 = vpop.f32.mrb[2].mxu0 }
 0x1d5   :  { %v335_v60 = vadd.f32 %v622_v58, %v334_v59  ;;  %v711_v61 = vpop.f32.mrb[3].mxu0 }
 0x1d7   :  { %v338_v62 = vmax.f32 %v335_v60, 0.0 }
 0x1d9   :  { %715 = vmatmul.mubr.msk.f32.vlgmr.msra.gmra.mrb[2].mxu1 %vm347_vm3, %v338_v62 }
 0x1da   :  { %577 = vmatprep.mubr.f32.mxu1 %v829_v48  ;;  %791 = vmatpush1.bf16.msra.mxu1 %v790_v10 }
 0x2ac   :  { %v421_v12 = vpop.f32.mrb[2].mxu1 }
 0x2ad   :  { %v422_v14 = vadd.f32 %v624_v11, %v421_v12  ;;  %v716_v15 = vpop.f32.mrb[3].mxu1 }
 0x2af   :  { %v627_v16 = vmul.f32 -1.442695, %v422_v14 }
 0x2b1   :  { %798 = vpow2.f32 %v627_v16 }
 0x2bb   :  { %v799_v17 = vpop.eup %798 }
 0x2bc   :  { %v428_v18 = vadd.f32 1.0, %v799_v17 }
 0x2be   :  { %800 = vrcp.f32 %v428_v18 }
 0x2c8   :  { %v801_v19 = vpop.eup %800 }
 0x2c9   :  { %628 = vmatmul.mubr.msk.f32.vlgmr.msra.gmra.mrb[4].mxu0 %vm264_vm1, %v801_v19  ;;  %629 = vmatmul.mubr.msk.f32.vlgmr.msra.gmra.mrb[4].mxu1 %vm264_vm1, %v801_v19 }
 0x39c   :  { %v508_v20 = vpop.f32.mrb[4].mxu0  ;;  %v579_v21 = vpop.f32.mrb[4].mxu1 }
 0x39d   :  { %v510_v23 = vpop.f32.mrb[5].mxu0  ;;  %v581_v24 = vpop.f32.mrb[5].mxu1 }
 0x39e   :  { %v588_v25 = vcombine.low %v508_v20, %v510_v23  ;;  %v589_v26 = vcombine.low %v579_v21, %v581_v24 }
 0x3a0   :  { %v596_v27 = vrot.slane %v588_v25, %v1021_v13  ;;  %v603_v28 = vrot.slane %v589_v26, %v1021_v13 }
 0x3a2   :  { %v604_v29 = vcombine.low %v596_v27, %v603_v28 }
 0x3a4   :  { %v606_v30 = vmul.f32 %v604_v29, %v1041_v22 }
 0x3a6   :  { %607 = vst [vmem:[#allocation2] sm:$0xff] %v606_v30 }
 0x3a7   :  { %813 = shalt.err (!%p810_p4)
}
 0x3a8   :  { %s814_s16 = scalar_lea.hbm %s1139_s7, 128 }
 0x3a9   :  { %p815_p5 = scmp.ne.s32.totalorder %s1139_s7, %s814_s16  ;;  %p818_p6 = scmp.lt.u32.totalorder %s814_s16, %s1139_s7 }
 0x3ab   :  { %p820_p7 = pnand %p818_p6, %p815_p5 }
 0x3ad   :  { %823 = shalt.err (!%p820_p7)
}
 0x3ae   :  { %617 = dma.vmem_to_hbm [thread:$0]  %s615_s6, 128, %s1139_s7, [#allocation3]  }
 0x3af   :  { %824 = dma.done.wait [#allocation3], 128  }
 0x3b0   :  { %825 = vsyncadd [#allocation3], 4294967168 }
 0x3b1   :  { %621 = vsyncpa [#allocation3], 1 }

</bundles_post_ra>
